<compile_context>
chip_gen: v5e
topology: v5e:2x2
jax: 0.10.0
libtpu: 0.0.40
codegen_flags: <defaults>
</compile_context>

<pallas_src>
import functools

import jax
import jax.numpy as jnp
from jax.experimental import pallas as pl
from jax.experimental.pallas import tpu as pltpu

DROPOUT_RATE = 0.1
INPUT_DIM = 128
NUM_LABELS = 2

# bits < threshold  -> drop   (P(drop) = threshold / 2^32 = DROPOUT_RATE)
_DROP_THRESHOLD = int(round(DROPOUT_RATE * (1 << 32)))
_GOLDEN = 0x9E3779B9  # Weyl constant for seed mixing (fallback hash path only)


def _mix_u32(z):
    """lowbias32-style integer finalizer (fallback path only; pure VPU ops)."""
    z = z ^ (z >> jnp.uint32(16))
    z = z * jnp.uint32(0x7FEB352D)
    z = z ^ (z >> jnp.uint32(15))
    z = z * jnp.uint32(0x846CA68B)
    z = z ^ (z >> jnp.uint32(16))
    return z


def classifier_kernel(seed_ref, x_ref, w_ref, b_ref, o_ref, *, tile_b, train,
                      use_hw_prng):
    x = x_ref[...]  # (tile_b, D) f32
    tb, d = x_ref.shape

    if train and DROPOUT_RATE > 0.0:
        if use_hw_prng:
            # HW PRNG: a full vreg of bits per instruction, off the VALU hot path.
            # Per-tile seed offset keeps masks distinct across batch tiles.
            pltpu.prng_seed(seed_ref[0] + pl.program_id(0))
            bits = pltpu.bitcast(pltpu.prng_random_bits((tb, d)), jnp.uint32)
        else:
            # Counter-hash fallback (interpret / non-TPU backends).  Scalar part
            # folded into one addend; per-element work is iota*d + iota + scalar.
            # NOTE: int32 element index wraps for > ~2^25 rows; fine for training.
            base = (
                (pl.program_id(0) * (tile_b * d)).astype(jnp.uint32)
                + seed_ref[0].astype(jnp.uint32) * jnp.uint32(_GOLDEN)
            )
            idx = (
                jax.lax.broadcasted_iota(jnp.int32, (tb, d), 0) * d
                + jax.lax.broadcasted_iota(jnp.int32, (tb, d), 1)
            ).astype(jnp.uint32)
            bits = _mix_u32(idx + base)
        keep = bits >= jnp.uint32(_DROP_THRESHOLD)
        # 1/(1-p) scale is pre-folded into the weight in the wrapper.
        x = jnp.where(keep, x, jnp.float32(0.0))

    # Transposed linear: y_T = W @ x^T -> (L, tile_b); lane-dense output block.
    y_t = jax.lax.dot_general(
        w_ref[...],  # (L, D), resident
        x,           # (tile_b, D)
        dimension_numbers=(((1,), (1,)), ((), ())),
        preferred_element_type=jnp.float32,
    )
    o_ref[...] = y_t + b_ref[...]  # bias is (L, 1), broadcasts over columns


def classifier_forward(x, weight, bias, seed, *, train=True, tile_b=8192,
                       use_hw_prng=None):
    """x: [B, D] f32, weight: [L, D] f32 (torch Linear layout), bias: [L] f32."""
    B, D = x.shape
    L = weight.shape[0]

    if use_hw_prng is None:
        use_hw_prng = jax.devices()[0].platform == "tpu"

    # ---- batch tile selection ------------------------------------------------
    tile_b = min(tile_b, B)
    # Keep >= 2 grid steps on large batches so v7x can shard across its 2 TCs.
    if B >= 2048:
        tile_b = min(tile_b, -(-B // 2))
    if tile_b < B:
        # Lane-dense output block (L, tile_b): lane dim must be % 128 == 0
        # (unless it spans the full batch).
        tile_b = max(128, ((tile_b + 127) // 128) * 128)
        if tile_b >= B:
            tile_b = B
    grid = (pl.cdiv(B, tile_b),)

    # ---- VMEM budget: 2x(x tile + padded out tile) + resident W/b, w/ headroom
    x_tile_bytes = tile_b * D * 4
    out_tile_bytes = 8 * max(128, ((tile_b + 127) // 128) * 128) * 4
    resident_bytes = (L * D + L) * 4 + (1 << 14)
    vmem_limit = int(min(
        max(2 * (2 * (x_tile_bytes + out_tile_bytes) + resident_bytes),
            16 * 1024 * 1024),
        44 * 1024 * 1024))

    # Fold the dropout 1/(1-p) scale into the tiny weight; bias stays unscaled.
    if train and DROPOUT_RATE > 0.0:
        w_eff = weight * jnp.float32(1.0 / (1.0 - DROPOUT_RATE))
    else:
        w_eff = weight
    b_col = bias.reshape(L, 1)
    seed_arr = jnp.asarray([seed], dtype=jnp.int32)

    kernel = functools.partial(classifier_kernel, tile_b=tile_b, train=train,
                               use_hw_prng=use_hw_prng)

    out_t = pl.pallas_call(
        kernel,
        out_shape=jax.ShapeDtypeStruct((L, B), jnp.float32),
        grid_spec=pltpu.PrefetchScalarGridSpec(
            num_scalar_prefetch=1,  # seed lands in SMEM before the grid runs
            grid=grid,
            in_specs=[
                pl.BlockSpec((tile_b, D), lambda i, seed: (i, 0)),  # x, streamed
                pl.BlockSpec((L, D), lambda i, seed: (0, 0)),       # W, resident
                pl.BlockSpec((L, 1), lambda i, seed: (0, 0)),       # bias, resident
            ],
            out_specs=pl.BlockSpec((L, tile_b), lambda i, seed: (0, i)),
        ),
        compiler_params=pltpu.CompilerParams(
            dimension_semantics=("parallel",),  # batch tiles are independent
            vmem_limit_bytes=vmem_limit,
        ),
    )(seed_arr, x, w_eff, b_col)

    # Tiny relayout back to the module's (B, L) contract.
    return out_t.T


if __name__ == "__main__":
    key = jax.random.PRNGKey(0)
    kx, kw, kb = jax.random.split(key, 3)

    B = 8  # small demo batch
    x = jax.random.normal(kx, (B, INPUT_DIM), dtype=jnp.float32)

    # Deterministic parameter init (matches nn.Linear shapes: W [L, D], b [L]).
    bound = 1.0 / (INPUT_DIM ** 0.5)
    weight = jax.random.uniform(
        kw, (NUM_LABELS, INPUT_DIM), minval=-bound, maxval=bound,
        dtype=jnp.float32)
    bias = jax.random.uniform(
        kb, (NUM_LABELS,), minval=-bound, maxval=bound, dtype=jnp.float32)

    # Training-mode forward (dropout + linear), as in the module's forward().
    # NOTE: dropout RNG stream cannot bit-match torch's; only math/distribution do.
    try:
        out = classifier_forward(x, weight, bias, seed=1234, train=True)
        jax.block_until_ready(out)
    except Exception:
        # Safety net: hash-based dropout if the HW PRNG can't lower here
        # (e.g. forced interpret mode).
        out = classifier_forward(x, weight, bias, seed=1234, train=True,
                                 use_hw_prng=False)
        jax.block_until_ready(out)
    assert out.shape == (B, NUM_LABELS)
    assert bool(jnp.all(jnp.isfinite(out)))

    # Sanity-check the linear path against a pure-JAX reference (dropout off).
    out_eval = classifier_forward(x, weight, bias, seed=1234, train=False)
    ref_eval = x @ weight.T + bias
    assert bool(jnp.allclose(out_eval, ref_eval, rtol=1e-5, atol=1e-5))

    print("KERNEL_OK")
</pallas_src>

<mosaic_0001>
module attributes {stable_mosaic.version = 11 : i64} {
  func.func @classifier_kernel(%arg0: i32, %arg1: memref<1xi32, #tpu.memory_space<smem>>, %arg2: memref<8x128xf32, #tpu.memory_space<vmem>>, %arg3: memref<2x128xf32, #tpu.memory_space<vmem>>, %arg4: memref<2x1xf32, #tpu.memory_space<vmem>>, %arg5: memref<2x8xf32, #tpu.memory_space<vmem>>) attributes {dimension_semantics = [#tpu.dimension_semantics<parallel>], iteration_bounds = array<i64: 1>, scalar_prefetch = 1 : i64, scratch_operands = 0 : i64, tpu.core_type = #tpu.core_type<tc>, window_params = [{transform_indices = @transform_0, window_bounds = array<i64: 8, 128>}, {pipeline_mode = #tpu.pipeline_mode<synchronous>, transform_indices = @transform_1, window_bounds = array<i64: 2, 128>}, {pipeline_mode = #tpu.pipeline_mode<synchronous>, transform_indices = @transform_2, window_bounds = array<i64: 2, 1>}, {transform_indices = @transform_3, window_bounds = array<i64: 2, 8>}]} {
    %c0 = arith.constant 0 : index
    %c0_0 = arith.constant 0 : index
    %0 = vector.load %arg2[%c0, %c0_0] : memref<8x128xf32, #tpu.memory_space<vmem>>, vector<8x128xf32>
    %c1024_i32 = arith.constant 1024 : i32
    %1 = arith.muli %arg0, %c1024_i32 : i32
    %c0_1 = arith.constant 0 : index
    %2 = memref.load %arg1[%c0_1] : memref<1xi32, #tpu.memory_space<smem>>
    %c-1640531527_i32 = arith.constant -1640531527 : i32
    %3 = arith.muli %2, %c-1640531527_i32 : i32
    %4 = arith.addi %1, %3 : i32
    %5 = tpu.iota {dimensions = array<i32: 0>} : vector<8x128xi32>
    %c128_i32 = arith.constant 128 : i32
    %6 = vector.broadcast %c128_i32 : i32 to vector<8x128xi32>
    %7 = arith.muli %5, %6 : vector<8x128xi32>
    %8 = tpu.iota {dimensions = array<i32: 1>} : vector<8x128xi32>
    %9 = arith.addi %7, %8 : vector<8x128xi32>
    %10 = vector.broadcast %4 : i32 to vector<8x128xi32>
    %11 = arith.addi %9, %10 : vector<8x128xi32>
    %c16_i32 = arith.constant 16 : i32
    %12 = vector.broadcast %c16_i32 : i32 to vector<8x128xi32>
    %13 = arith.shrui %11, %12 : vector<8x128xi32>
    %14 = arith.xori %11, %13 : vector<8x128xi32>
    %c2146121005_i32 = arith.constant 2146121005 : i32
    %15 = vector.broadcast %c2146121005_i32 : i32 to vector<8x128xi32>
    %16 = arith.muli %14, %15 : vector<8x128xi32>
    %c15_i32 = arith.constant 15 : i32
    %17 = vector.broadcast %c15_i32 : i32 to vector<8x128xi32>
    %18 = arith.shrui %16, %17 : vector<8x128xi32>
    %19 = arith.xori %16, %18 : vector<8x128xi32>
    %c-2073254261_i32 = arith.constant -2073254261 : i32
    %20 = vector.broadcast %c-2073254261_i32 : i32 to vector<8x128xi32>
    %21 = arith.muli %19, %20 : vector<8x128xi32>
    %c16_i32_2 = arith.constant 16 : i32
    %22 = vector.broadcast %c16_i32_2 : i32 to vector<8x128xi32>
    %23 = arith.shrui %21, %22 : vector<8x128xi32>
    %24 = arith.xori %21, %23 : vector<8x128xi32>
    %c429496730_i32 = arith.constant 429496730 : i32
    %25 = vector.broadcast %c429496730_i32 : i32 to vector<8x128xi32>
    %26 = arith.cmpi uge, %24, %25 : vector<8x128xi32>
    %cst = arith.constant 0.000000e+00 : f32
    %27 = vector.broadcast %cst : f32 to vector<8x128xf32>
    %28 = arith.select %26, %0, %27 : vector<8x128xi1>, vector<8x128xf32>
    %c0_3 = arith.constant 0 : index
    %c0_4 = arith.constant 0 : index
    %29 = vector.load %arg3[%c0_3, %c0_4] : memref<2x128xf32, #tpu.memory_space<vmem>>, vector<2x128xf32>
    %cst_5 = arith.constant dense<0.000000e+00> : vector<2x8xf32>
    %30 = tpu.matmul %29, %28, %cst_5 {dimension_numbers = #tpu.dot_dimension_numbers<[1], [1], [0], [0], [0, 0, 1, 0], [], []>} : vector<2x128xf32>, vector<8x128xf32>, vector<2x8xf32> -> vector<2x8xf32>
    %c0_6 = arith.constant 0 : index
    %c0_7 = arith.constant 0 : index
    %31 = vector.load %arg4[%c0_6, %c0_7] : memref<2x1xf32, #tpu.memory_space<vmem>>, vector<2x1xf32>
    %32 = vector.broadcast %31 : vector<2x1xf32> to vector<2x8xf32>
    %33 = arith.addf %30, %32 : vector<2x8xf32>
    %c0_8 = arith.constant 0 : index
    %c0_9 = arith.constant 0 : index
    %34 = vector.load %arg5[%c0_8, %c0_9] : memref<2x8xf32, #tpu.memory_space<vmem>>, vector<2x8xf32>
    tpu.vector_store %arg5[%c0_8, %c0_9], %33 {strides = array<i32>} : memref<2x8xf32, #tpu.memory_space<vmem>>, vector<2x8xf32>,
    return
  }
  func.func @transform_0(%arg0: i32, %arg1: memref<1xi32, #tpu.memory_space<smem>>) -> (i32, i32) {
    %c0_i32 = arith.constant 0 : i32
    %c0_i32_0 = arith.constant 0 : i32
    return %arg0, %c0_i32 : i32, i32
  }
  func.func @transform_1(%arg0: i32, %arg1: memref<1xi32, #tpu.memory_space<smem>>) -> (i32, i32) {
    %c0_i32 = arith.constant 0 : i32
    %c0_i32_0 = arith.constant 0 : i32
    %c0_i32_1 = arith.constant 0 : i32
    return %c0_i32, %c0_i32_0 : i32, i32
  }
  func.func @transform_2(%arg0: i32, %arg1: memref<1xi32, #tpu.memory_space<smem>>) -> (i32, i32) {
    %c0_i32 = arith.constant 0 : i32
    %c0_i32_0 = arith.constant 0 : i32
    %c0_i32_1 = arith.constant 0 : i32
    return %c0_i32, %c0_i32_0 : i32, i32
  }
  func.func @transform_3(%arg0: i32, %arg1: memref<1xi32, #tpu.memory_space<smem>>) -> (i32, i32) {
    %c0_i32 = arith.constant 0 : i32
    %c0_i32_0 = arith.constant 0 : i32
    return %c0_i32, %arg0 : i32, i32
  }
}

module attributes {stable_mosaic.version = 11 : i64} {
  func.func @classifier_kernel(%arg0: i32, %arg1: memref<1xi32, #tpu.memory_space<smem>>, %arg2: memref<8x128xf32, #tpu.memory_space<vmem>>, %arg3: memref<2x128xf32, #tpu.memory_space<vmem>>, %arg4: memref<2x1xf32, #tpu.memory_space<vmem>>, %arg5: memref<2x8xf32, #tpu.memory_space<vmem>>) attributes {dimension_semantics = [#tpu.dimension_semantics<parallel>], iteration_bounds = array<i64: 1>, scalar_prefetch = 1 : i64, scratch_operands = 0 : i64, tpu.core_type = #tpu.core_type<tc>, window_params = [{transform_indices = @transform_0, window_bounds = array<i64: 8, 128>}, {pipeline_mode = #tpu.pipeline_mode<synchronous>, transform_indices = @transform_1, window_bounds = array<i64: 2, 128>}, {pipeline_mode = #tpu.pipeline_mode<synchronous>, transform_indices = @transform_2, window_bounds = array<i64: 2, 1>}, {transform_indices = @transform_3, window_bounds = array<i64: 2, 8>}]} {
    %c0 = arith.constant 0 : index
    %c0_0 = arith.constant 0 : index
    %0 = vector.load %arg2[%c0, %c0_0] : memref<8x128xf32, #tpu.memory_space<vmem>>, vector<8x128xf32>
    %c1024_i32 = arith.constant 1024 : i32
    %1 = arith.muli %arg0, %c1024_i32 : i32
    %c0_1 = arith.constant 0 : index
    %2 = memref.load %arg1[%c0_1] : memref<1xi32, #tpu.memory_space<smem>>
    %c-1640531527_i32 = arith.constant -1640531527 : i32
    %3 = arith.muli %2, %c-1640531527_i32 : i32
    %4 = arith.addi %1, %3 : i32
    %5 = tpu.iota {dimensions = array<i32: 0>} : vector<8x128xi32>
    %c128_i32 = arith.constant 128 : i32
    %6 = vector.broadcast %c128_i32 : i32 to vector<8x128xi32>
    %7 = arith.muli %5, %6 : vector<8x128xi32>
    %8 = tpu.iota {dimensions = array<i32: 1>} : vector<8x128xi32>
    %9 = arith.addi %7, %8 : vector<8x128xi32>
    %10 = vector.broadcast %4 : i32 to vector<8x128xi32>
    %11 = arith.addi %9, %10 : vector<8x128xi32>
    %c16_i32 = arith.constant 16 : i32
    %12 = vector.broadcast %c16_i32 : i32 to vector<8x128xi32>
    %13 = arith.shrui %11, %12 : vector<8x128xi32>
    %14 = arith.xori %11, %13 : vector<8x128xi32>
    %c2146121005_i32 = arith.constant 2146121005 : i32
    %15 = vector.broadcast %c2146121005_i32 : i32 to vector<8x128xi32>
    %16 = arith.muli %14, %15 : vector<8x128xi32>
    %c15_i32 = arith.constant 15 : i32
    %17 = vector.broadcast %c15_i32 : i32 to vector<8x128xi32>
    %18 = arith.shrui %16, %17 : vector<8x128xi32>
    %19 = arith.xori %16, %18 : vector<8x128xi32>
    %c-2073254261_i32 = arith.constant -2073254261 : i32
    %20 = vector.broadcast %c-2073254261_i32 : i32 to vector<8x128xi32>
    %21 = arith.muli %19, %20 : vector<8x128xi32>
    %c16_i32_2 = arith.constant 16 : i32
    %22 = vector.broadcast %c16_i32_2 : i32 to vector<8x128xi32>
    %23 = arith.shrui %21, %22 : vector<8x128xi32>
    %24 = arith.xori %21, %23 : vector<8x128xi32>
    %c429496730_i32 = arith.constant 429496730 : i32
    %25 = vector.broadcast %c429496730_i32 : i32 to vector<8x128xi32>
    %26 = arith.cmpi uge, %24, %25 : vector<8x128xi32>
    %cst = arith.constant 0.000000e+00 : f32
    %27 = vector.broadcast %cst : f32 to vector<8x128xf32>
    %28 = arith.select %26, %0, %27 : vector<8x128xi1>, vector<8x128xf32>
    %c0_3 = arith.constant 0 : index
    %c0_4 = arith.constant 0 : index
    %29 = vector.load %arg3[%c0_3, %c0_4] : memref<2x128xf32, #tpu.memory_space<vmem>>, vector<2x128xf32>
    %cst_5 = arith.constant dense<0.000000e+00> : vector<2x8xf32>
    %30 = tpu.matmul %29, %28, %cst_5 {dimension_numbers = #tpu.dot_dimension_numbers<[1], [1], [0], [0], [0, 0, 1, 0], [], []>} : vector<2x128xf32>, vector<8x128xf32>, vector<2x8xf32> -> vector<2x8xf32>
    %c0_6 = arith.constant 0 : index
    %c0_7 = arith.constant 0 : index
    %31 = vector.load %arg4[%c0_6, %c0_7] : memref<2x1xf32, #tpu.memory_space<vmem>>, vector<2x1xf32>
    %32 = vector.broadcast %31 : vector<2x1xf32> to vector<2x8xf32>
    %33 = arith.addf %30, %32 : vector<2x8xf32>
    %c0_8 = arith.constant 0 : index
    %c0_9 = arith.constant 0 : index
    %34 = vector.load %arg5[%c0_8, %c0_9] : memref<2x8xf32, #tpu.memory_space<vmem>>, vector<2x8xf32>
    tpu.vector_store %arg5[%c0_8, %c0_9], %33 {strides = array<i32>} : memref<2x8xf32, #tpu.memory_space<vmem>>, vector<2x8xf32>,
    return
  }
  func.func @transform_0(%arg0: i32, %arg1: memref<1xi32, #tpu.memory_space<smem>>) -> (i32, i32) {
    %c0_i32 = arith.constant 0 : i32
    %c0_i32_0 = arith.constant 0 : i32
    return %arg0, %c0_i32 : i32, i32
  }
  func.func @transform_1(%arg0: i32, %arg1: memref<1xi32, #tpu.memory_space<smem>>) -> (i32, i32) {
    %c0_i32 = arith.constant 0 : i32
    %c0_i32_0 = arith.constant 0 : i32
    %c0_i32_1 = arith.constant 0 : i32
    return %c0_i32, %c0_i32_0 : i32, i32
  }
  func.func @transform_2(%arg0: i32, %arg1: memref<1xi32, #tpu.memory_space<smem>>) -> (i32, i32) {
    %c0_i32 = arith.constant 0 : i32
    %c0_i32_0 = arith.constant 0 : i32
    %c0_i32_1 = arith.constant 0 : i32
    return %c0_i32, %c0_i32_0 : i32, i32
  }
  func.func @transform_3(%arg0: i32, %arg1: memref<1xi32, #tpu.memory_space<smem>>) -> (i32, i32) {
    %c0_i32 = arith.constant 0 : i32
    %c0_i32_0 = arith.constant 0 : i32
    return %c0_i32, %arg0 : i32, i32
  }
}

</mosaic_0001>

<bundles_post_ra>
// kernel: tpu_custom_call.1
= control target key start
LH: loop header
LB: loop body
LE: loop exit
PB: predicated region body
PF: predicated region fallthrough
CT: control target
= control target key end

     0   :  { %10 = vsyncpa [#allocation5], 0  ;;  %s203_s0 = inlined_call_operand.<no memory space> [shape: s32[1], index: 0, kind: input, shape index: {}]   ;;  %s204_s1 = inlined_call_operand.hbm [shape: f32[8,128], index: 1, kind: input, shape index: {}]   ;;  %s205_s2 = inlined_call_operand.vmem [shape: f32[2,128], index: 2, kind: input, shape index: {}]   ;;  %s206_s3 = inlined_call_operand.vmem [shape: f32[2,1], index: 3, kind: input, shape index: {}]   ;;  %s207_s4 = inlined_call_operand.hbm [shape: f32[2,8], index: 4, kind: output, shape index: {}]  }
   0x1   :  { %11 = vsyncpa [#allocation6], 0  ;;  %s17_s17 = sshll.u32 %s204_s1, 4  ;;  %s160_s18 = smov [#allocation4]   ;;  %s18_s17 = int_to_ptr.hbm [resolvable:$true] %s17_s17 }
   0x2   :  { %s19_s19 = sshll.u32 %s160_s18, 4  ;;  %s20_s19 = int_to_ptr.vmem [resolvable:$true] %s19_s19 }
   0x3   :  { %22 = dma.hbm_to_vmem [thread:$0]  %s18_s17, 128, %s20_s19, [#allocation5]  }
   0x4   :  { %156 = dma.done.wait [#allocation5], 128  }
   0x5   :  { %157 = vsyncadd [#allocation5], 4294967168  ;;  %v36_v0 = vlaneseq  ;;  %s34_s22 = smul.u32 2654435769, %s203_s0  ;;  %v161_v1 = vmov 0   ;;  %v31_v17 = vld [vmem:[#allocation4] sm:$0xff] }
   0x6   :  { %107 = vset.pattern.permute.xlu0 %v161_v1  ;;  %v57_v7 = vld [vmem:[%s206_s3] sm:$0x3]  ;;  %s162_s3 = smov [#allocation7]   ;;  %s92_s28 = sshll.u32 %s207_s4, 4  ;;  %vm83_vm1 = vcmask 58368   ;;  %s93_s28 = int_to_ptr.hbm [resolvable:$true] %s92_s28 }
   0x7   :  { %v37_v2 = vshrl.u32 %v36_v0, 7  ;;  %v40_v3 = vand.u32 127, %v36_v0  ;;  %v42_v5 = vstv %s34_s22  ;;  %60 = vperm.xlu0 %107, %v57_v7   ;;  %v56_v19 = vld [vmem:[%s205_s2] sm:$0x3]  ;;  %s90_s25 = sshll.u32 %s162_s3, 4  ;;  %s91_s25 = int_to_ptr.vmem [resolvable:$true] %s90_s25 }
   0x9   :  { %v38_v4 = vmul.u32 128, %v37_v2 }
   0xb   :  { %v41_v6 = vadd.s32 %v40_v3, %v38_v4 }
   0xd   :  { %v43_v8 = vadd.s32 %v42_v5, %v41_v6 }
   0xf   :  { %v44_v9 = vshrl.u32 %v43_v8, 16 }
  0x11   :  { %v45_v10 = vxor.u32 %v44_v9, %v43_v8 }
  0x13   :  { %v46_v11 = vmul.u32 2146121005, %v45_v10 }
  0x15   :  { %v47_v12 = vshrl.u32 %v46_v11, 15 }
  0x17   :  { %v48_v13 = vxor.u32 %v47_v12, %v46_v11 }
  0x19   :  { %v49_v14 = vmul.u32 2221713035, %v48_v13 }
  0x1b   :  { %v50_v15 = vshrl.u32 %v49_v14, 16 }
  0x1d   :  { %v51_v16 = vxor.u32 %v50_v15, %v49_v14 }
  0x1f   :  { %v102_v18 = vxor.u32 2147483648, %v51_v16 }
  0x21   :  { %vm54_vm0 = vcmp.ge.s32.totalorder %v102_v18, 2576980378 }
  0x22   :  { %103 = vmatpush.xpose.msk.msra.mxu0 %vm54_vm0, %v31_v17 }
  0x25   :  { %79 = vmatmul.f32.vlgmr.msra.gmra.mxu0 %v56_v19 }
  0x79   :  { %v61_v20 = vpop.permute.xlu0 %60 }
  0xa2   :  { %v80_v21 = vpop.f32.mrf.mxu0 }
  0xa3   :  { %v81_v22 = vadd.f32 %v80_v21, %v61_v20 }
  0xa5   :  { %84 = vst.msk [vmem:[#allocation7] sm:$0x3] %vm83_vm1, %v81_v22 }
  0xa6   :  { %95 = dma.vmem_to_hbm [thread:$0]  %s91_s25, 32, %s93_s28, [#allocation6]  }
  0xa7   :  { %158 = dma.done.wait [#allocation6], 32  }
  0xa8   :  { %159 = vsyncadd [#allocation6], 4294967264 }
  0xa9   :  { %100 = vsyncpa [#allocation5], 1 }
  0xaa   :  { %101 = vsyncpa [#allocation6], 1 }

// kernel: tpu_custom_call.1
= control target key start
LH: loop header
LB: loop body
LE: loop exit
PB: predicated region body
PF: predicated region fallthrough
CT: control target
= control target key end

     0   :  { %10 = vsyncpa [#allocation5], 0  ;;  %s203_s0 = inlined_call_operand.<no memory space> [shape: s32[1], index: 0, kind: input, shape index: {}]   ;;  %s204_s1 = inlined_call_operand.hbm [shape: f32[8,128], index: 1, kind: input, shape index: {}]   ;;  %s205_s2 = inlined_call_operand.vmem [shape: f32[2,128], index: 2, kind: input, shape index: {}]   ;;  %s206_s3 = inlined_call_operand.vmem [shape: f32[2,1], index: 3, kind: input, shape index: {}]   ;;  %s207_s4 = inlined_call_operand.hbm [shape: f32[2,8], index: 4, kind: output, shape index: {}]  }
   0x1   :  { %11 = vsyncpa [#allocation6], 0  ;;  %s17_s17 = sshll.u32 %s204_s1, 4  ;;  %s160_s18 = smov [#allocation4]   ;;  %s18_s17 = int_to_ptr.hbm [resolvable:$true] %s17_s17 }
   0x2   :  { %s19_s19 = sshll.u32 %s160_s18, 4  ;;  %s20_s19 = int_to_ptr.vmem [resolvable:$true] %s19_s19 }
   0x3   :  { %22 = dma.hbm_to_vmem [thread:$0]  %s18_s17, 128, %s20_s19, [#allocation5]  }
   0x4   :  { %156 = dma.done.wait [#allocation5], 128  }
   0x5   :  { %157 = vsyncadd [#allocation5], 4294967168  ;;  %v36_v0 = vlaneseq  ;;  %s34_s22 = smul.u32 2654435769, %s203_s0  ;;  %v161_v1 = vmov 0   ;;  %v31_v17 = vld [vmem:[#allocation4] sm:$0xff] }
   0x6   :  { %107 = vset.pattern.permute.xlu0 %v161_v1  ;;  %v57_v7 = vld [vmem:[%s206_s3] sm:$0x3]  ;;  %s162_s3 = smov [#allocation7]   ;;  %s92_s28 = sshll.u32 %s207_s4, 4  ;;  %vm83_vm1 = vcmask 58368   ;;  %s93_s28 = int_to_ptr.hbm [resolvable:$true] %s92_s28 }
   0x7   :  { %v37_v2 = vshrl.u32 %v36_v0, 7  ;;  %v40_v3 = vand.u32 127, %v36_v0  ;;  %v42_v5 = vstv %s34_s22  ;;  %60 = vperm.xlu0 %107, %v57_v7   ;;  %v56_v19 = vld [vmem:[%s205_s2] sm:$0x3]  ;;  %s90_s25 = sshll.u32 %s162_s3, 4  ;;  %s91_s25 = int_to_ptr.vmem [resolvable:$true] %s90_s25 }
   0x9   :  { %v38_v4 = vmul.u32 128, %v37_v2 }
   0xb   :  { %v41_v6 = vadd.s32 %v40_v3, %v38_v4 }
   0xd   :  { %v43_v8 = vadd.s32 %v42_v5, %v41_v6 }
   0xf   :  { %v44_v9 = vshrl.u32 %v43_v8, 16 }
  0x11   :  { %v45_v10 = vxor.u32 %v44_v9, %v43_v8 }
  0x13   :  { %v46_v11 = vmul.u32 2146121005, %v45_v10 }
  0x15   :  { %v47_v12 = vshrl.u32 %v46_v11, 15 }
  0x17   :  { %v48_v13 = vxor.u32 %v47_v12, %v46_v11 }
  0x19   :  { %v49_v14 = vmul.u32 2221713035, %v48_v13 }
  0x1b   :  { %v50_v15 = vshrl.u32 %v49_v14, 16 }
  0x1d   :  { %v51_v16 = vxor.u32 %v50_v15, %v49_v14 }
  0x1f   :  { %v102_v18 = vxor.u32 2147483648, %v51_v16 }
  0x21   :  { %vm54_vm0 = vcmp.ge.s32.totalorder %v102_v18, 2576980378 }
  0x22   :  { %103 = vmatpush.xpose.msk.msra.mxu0 %vm54_vm0, %v31_v17 }
  0x25   :  { %79 = vmatmul.f32.vlgmr.msra.gmra.mxu0 %v56_v19 }
  0x79   :  { %v61_v20 = vpop.permute.xlu0 %60 }
  0xa2   :  { %v80_v21 = vpop.f32.mrf.mxu0 }
  0xa3   :  { %v81_v22 = vadd.f32 %v80_v21, %v61_v20 }
  0xa5   :  { %84 = vst.msk [vmem:[#allocation7] sm:$0x3] %vm83_vm1, %v81_v22 }
  0xa6   :  { %95 = dma.vmem_to_hbm [thread:$0]  %s91_s25, 32, %s93_s28, [#allocation6]  }
  0xa7   :  { %158 = dma.done.wait [#allocation6], 32  }
  0xa8   :  { %159 = vsyncadd [#allocation6], 4294967264 }
  0xa9   :  { %100 = vsyncpa [#allocation5], 1 }
  0xaa   :  { %101 = vsyncpa [#allocation6], 1 }

</bundles_post_ra>
